<compile_context>
chip_gen: v7x
topology: tpu7x:2x2x1
jax: 0.10.0
libtpu: 0.0.40
codegen_flags: <defaults>
</compile_context>

<pallas_src>
import functools

import jax
import jax.numpy as jnp
from jax.experimental import pallas as pl
from jax.experimental.pallas import tpu as pltpu


# --------------------------------------------------------------------------
# Kernels
# --------------------------------------------------------------------------
def _se_fused_kernel(x_ref, w1t_ref, b1_ref, w2t_ref, b2_ref, o_ref, *, inv_hw):
    # x_ref: (NB, C, HWp)   w1t_ref: (C, Cs)  b1_ref: (1, Cs)
    #                       w2t_ref: (Cs, C)  b2_ref: (1, C)
    # Global average pool over the (lane) spatial axis; f32 accumulation,
    # scaled by the true (un-padded) spatial size.
    pooled = jnp.sum(x_ref[...], axis=-1, dtype=jnp.float32) * inv_hw      # (NB, C)

    # Squeeze: 1x1 conv C -> Cs, then SiLU (batched over NB samples).
    s = jnp.dot(pooled, w1t_ref[...],
                preferred_element_type=jnp.float32) + b1_ref[...]          # (NB, Cs)
    s = s * jax.nn.sigmoid(s)

    # Excite: 1x1 conv Cs -> C, then sigmoid gate.
    g = jnp.dot(s, w2t_ref[...],
                preferred_element_type=jnp.float32) + b2_ref[...]          # (NB, C)
    g = jax.nn.sigmoid(g)

    # Re-read the tile for the gate multiply so the big activation block does
    # not stay live across the pool + matmuls (reduces spill risk at large NB).
    x = x_ref[...]
    o_ref[...] = (x * g[:, :, None].astype(x.dtype)).astype(o_ref.dtype)


def _pool_kernel(x_ref, sum_ref):
    # Two-pass fallback, pass 1: accumulate per-(sample, channel) spatial sums
    # across HW tiles in f32.  sum_ref: (1, 1, C) resident across the t axis.
    @pl.when(pl.program_id(1) == 0)
    def _():
        sum_ref[...] = jnp.zeros_like(sum_ref)
    s = jnp.sum(x_ref[...], axis=-1, dtype=jnp.float32)                    # (1, C)
    sum_ref[...] += s[:, None, :]                                          # (1, 1, C)


def _scale_kernel(p_ref, w1t_ref, b1_ref, w2t_ref, b2_ref, x_ref, o_ref, *, inv_hw):
    # Two-pass fallback, pass 2: recompute the (tiny) gate per HW tile and
    # scale the streaming x tile.  p_ref: (1, 1, C) spatial sums.
    pooled = p_ref[...][:, 0, :] * inv_hw                                  # (1, C) f32
    s = jnp.dot(pooled, w1t_ref[...],
                preferred_element_type=jnp.float32) + b1_ref[...]
    s = s * jax.nn.sigmoid(s)
    g = jnp.dot(s, w2t_ref[...],
                preferred_element_type=jnp.float32) + b2_ref[...]
    g = jax.nn.sigmoid(g)
    x = x_ref[...]
    o_ref[...] = (x * g[:, :, None].astype(x.dtype)).astype(o_ref.dtype)


# --------------------------------------------------------------------------
# Sizing helpers
# --------------------------------------------------------------------------
def _tpu_hw():
    """(physical VMEM bytes, inferred #TensorCores sharing the parallel grid)."""
    vmem = 64 << 20                     # conservative default: safe on every gen
    try:
        info = pltpu.get_tpu_info()
        vmem = int(getattr(info, "vmem_capacity_bytes", vmem))
    except Exception:
        pass
    # v7x exposes 64 MiB per TensorCore and has 2 TCs; v5e/v6e are 1-TC 128 MiB.
    cores = 2 if vmem <= (64 << 20) else 1
    return vmem, cores


def _pick_nb(n, c, hw, itemsize, *, vmem_budget_bytes, num_cores=1):
    """Largest NB dividing N whose double-buffered in+out blocks fit the budget.
    On multi-TC parts, prefer an NB whose grid splits evenly across cores
    (ideally >=2 steps per core) so the 'parallel' axis stays load-balanced."""
    per_sample = max(1, c * hw * itemsize)
    cap = max(1, int(vmem_budget_bytes) // (4 * per_sample))
    cap = min(cap, n)
    divisors = [d for d in range(1, cap + 1) if n % d == 0]
    if num_cores > 1:
        steady = [d for d in divisors
                  if (n // d) % num_cores == 0 and (n // d) >= 2 * num_cores]
        balanced = [d for d in divisors if (n // d) % num_cores == 0]
        divisors = steady or balanced or divisors
    return max(divisors)


def _pick_hw_tile(hwp, c, itemsize, budget):
    """Largest multiple of 128 dividing HWp whose double-buffered in+out tiles
    fit the budget (two-pass fallback path only)."""
    cap = max(128, int(budget) // (4 * max(1, c * itemsize)))
    best, t = 128, 128
    while t <= min(hwp, cap):
        if hwp % t == 0:
            best = t
        t += 128
    return best


# --------------------------------------------------------------------------
# pallas_call wrappers
# --------------------------------------------------------------------------
def _se_fused(x2, w1t, b1_2, w2t, b2_2, hw_true, nb, budget, vmem_cap, num_cores):
    N, C, HWp = x2.shape
    Cs = w1t.shape[1]
    itemsize = jnp.dtype(x2.dtype).itemsize

    if nb is None:
        nb = _pick_nb(N, C, HWp, itemsize,
                      vmem_budget_bytes=budget, num_cores=num_cores)
    assert N % nb == 0, "NB must divide the batch size"
    grid_n = N // nb

    block_bytes = nb * C * HWp * itemsize
    weight_bytes = 2 * C * Cs * itemsize + 4 * (C + Cs)
    vmem_needed = 4 * block_bytes + 2 * weight_bytes + (2 << 20)
    vmem_limit = int(min(max(32 << 20, vmem_needed), vmem_cap))

    cost = pl.CostEstimate(
        flops=4 * N * C * Cs + 2 * N * C * HWp,      # tiny; op is HBM-bound
        transcendentals=N * (C + Cs),
        bytes_accessed=2 * N * C * HWp * itemsize,
    )

    kernel = functools.partial(_se_fused_kernel, inv_hw=1.0 / hw_true)
    return pl.pallas_call(
        kernel,
        out_shape=jax.ShapeDtypeStruct((N, C, HWp), x2.dtype),
        grid_spec=pltpu.PrefetchScalarGridSpec(
            num_scalar_prefetch=0,
            grid=(grid_n,),
            in_specs=[
                pl.BlockSpec((nb, C, HWp), lambda n: (n, 0, 0)),   # x block
                pl.BlockSpec((C, Cs), lambda n: (0, 0)),           # w1^T (resident)
                pl.BlockSpec((1, Cs), lambda n: (0, 0)),           # b1
                pl.BlockSpec((Cs, C), lambda n: (0, 0)),           # w2^T (resident)
                pl.BlockSpec((1, C), lambda n: (0, 0)),            # b2
            ],
            out_specs=pl.BlockSpec((nb, C, HWp), lambda n: (n, 0, 0)),
        ),
        compiler_params=pltpu.CompilerParams(
            dimension_semantics=("parallel",),
            vmem_limit_bytes=vmem_limit,
        ),
        cost_estimate=cost,
    )(x2, w1t, b1_2, w2t, b2_2)


def _se_two_pass(x2, w1t, b1_2, w2t, b2_2, hw_true, budget, vmem_cap, num_cores):
    """Fallback when one (1, C, HWp) plane exceeds the VMEM budget."""
    N, C, HWp = x2.shape
    Cs = w1t.shape[1]
    itemsize = jnp.dtype(x2.dtype).itemsize

    hwt = _pick_hw_tile(HWp, C, itemsize, budget)
    n_t = HWp // hwt

    # Pass 1: per-(sample, channel) spatial sums, accumulated across HW tiles.
    pool_limit = int(min(max(32 << 20, 2 * C * hwt * itemsize + (2 << 20)), vmem_cap))
    sums = pl.pallas_call(
        _pool_kernel,
        out_shape=jax.ShapeDtypeStruct((N, 1, C), jnp.float32),
        grid_spec=pltpu.PrefetchScalarGridSpec(
            num_scalar_prefetch=0,
            grid=(N, n_t),
            in_specs=[pl.BlockSpec((1, C, hwt), lambda n, t: (n, 0, t))],
            out_specs=pl.BlockSpec((1, 1, C), lambda n, t: (n, 0, 0)),
        ),
        compiler_params=pltpu.CompilerParams(
            dimension_semantics=("parallel", "arbitrary"),
            vmem_limit_bytes=pool_limit,
        ),
        cost_estimate=pl.CostEstimate(
            flops=N * C * HWp, transcendentals=0,
            bytes_accessed=N * C * HWp * itemsize),
    )(x2)

    # Pass 2: recompute the tiny gate per tile (negligible FLOPs) and scale x.
    scale_limit = int(min(max(32 << 20, 4 * C * hwt * itemsize + (4 << 20)), vmem_cap))
    kernel = functools.partial(_scale_kernel, inv_hw=1.0 / hw_true)
    return pl.pallas_call(
        kernel,
        out_shape=jax.ShapeDtypeStruct((N, C, HWp), x2.dtype),
        grid_spec=pltpu.PrefetchScalarGridSpec(
            num_scalar_prefetch=0,
            grid=(N, n_t),
            in_specs=[
                pl.BlockSpec((1, 1, C), lambda n, t: (n, 0, 0)),   # pooled sums
                pl.BlockSpec((C, Cs), lambda n, t: (0, 0)),
                pl.BlockSpec((1, Cs), lambda n, t: (0, 0)),
                pl.BlockSpec((Cs, C), lambda n, t: (0, 0)),
                pl.BlockSpec((1, C), lambda n, t: (0, 0)),
                pl.BlockSpec((1, C, hwt), lambda n, t: (n, 0, t)),  # x tile
            ],
            out_specs=pl.BlockSpec((1, C, hwt), lambda n, t: (n, 0, t)),
        ),
        compiler_params=pltpu.CompilerParams(
            dimension_semantics=("parallel", "parallel"),
            vmem_limit_bytes=scale_limit,
        ),
        cost_estimate=pl.CostEstimate(
            flops=4 * N * n_t * C * Cs + 2 * N * C * HWp,
            transcendentals=N * n_t * (C + Cs),
            bytes_accessed=2 * N * C * HWp * itemsize),
    )(sums, w1t, b1_2, w2t, b2_2, x2)


@functools.partial(jax.jit, static_argnames=("nb", "force_two_pass"))
def squeeze_excitation(x, w1, b1, w2, b2, *, nb=None, force_two_pass=False):
    """x: (N, C, H, W); w1: (Cs, C), b1: (Cs,), w2: (C, Cs), b2: (C,)."""
    N, C, H, W = x.shape
    Cs = w1.shape[0]
    HW = H * W
    itemsize = jnp.dtype(x.dtype).itemsize

    vmem_phys, num_cores = _tpu_hw()
    budget = max(16 << 20, int(0.6 * vmem_phys))                  # block picker budget
    vmem_cap = max(32 << 20, min(vmem_phys - (12 << 20), 100 << 20))

    # Lane-dense layout: pad flattened spatial axis to a multiple of 128.
    # Zeros do not change the sum (we divide by the true HW); padded columns
    # are sliced off below.
    HWp = int(pl.cdiv(HW, 128)) * 128
    x2 = x.reshape(N, C, HW)
    if HWp != HW:
        x2 = jnp.pad(x2, ((0, 0), (0, 0), (0, HWp - HW)))

    # Weights in the activation dtype (halves weight DMA for bf16 inputs);
    # biases stay f32 (added to the f32 matmul results).
    w1t = jnp.transpose(w1).astype(x.dtype)          # (C, Cs)
    w2t = jnp.transpose(w2).astype(x.dtype)          # (Cs, C)
    b1_2 = b1.astype(jnp.float32).reshape(1, Cs)
    b2_2 = b2.astype(jnp.float32).reshape(1, C)

    plane_fits = 4 * C * HWp * itemsize <= budget    # nb=1 block, dbl-buffered in+out
    if force_two_pass or not plane_fits:
        out2 = _se_two_pass(x2, w1t, b1_2, w2t, b2_2, HW, budget, vmem_cap, num_cores)
    else:
        out2 = _se_fused(x2, w1t, b1_2, w2t, b2_2, HW, nb, budget, vmem_cap, num_cores)

    return out2[:, :, :HW].reshape(N, C, H, W)


# --------------------------------------------------------------------------
# Pure-JAX reference (matches the PyTorch module: SiLU inner, Sigmoid gate)
# --------------------------------------------------------------------------
def squeeze_excitation_ref(x, w1, b1, w2, b2):
    pooled = jnp.mean(x, axis=(2, 3), keepdims=True)              # (N, C, 1, 1)
    s = jnp.einsum('sc,ncij->nsij', w1, pooled) + b1[None, :, None, None]
    s = s * jax.nn.sigmoid(s)                                     # SiLU
    g = jnp.einsum('cs,nsij->ncij', w2, s) + b2[None, :, None, None]
    g = jax.nn.sigmoid(g)
    return x * g


if __name__ == "__main__":
    def make_inputs(key, N, C, H, W, dtype=jnp.float32):
        Cs = C // 4
        kx, k1, k2, k3, k4 = jax.random.split(key, 5)
        x = jax.random.normal(kx, (N, C, H, W), dtype=dtype)
        # 1x1 conv weights: Conv2d(C, Cs, 1) -> (Cs, C); Conv2d(Cs, C, 1) -> (C, Cs)
        w1 = jax.random.normal(k1, (Cs, C), dtype=jnp.float32) * 0.3
        b1 = jax.random.normal(k2, (Cs,), dtype=jnp.float32) * 0.1
        w2 = jax.random.normal(k3, (C, Cs), dtype=jnp.float32) * 0.3
        b2 = jax.random.normal(k4, (C,), dtype=jnp.float32) * 0.1
        return x, w1, b1, w2, b2

    key = jax.random.PRNGKey(0)

    # 1) Fused fast path, HW already a multiple of 128.
    args = make_inputs(key, 2, 8, 16, 16)
    out = jax.block_until_ready(squeeze_excitation(*args))
    ref = squeeze_excitation_ref(*args)
    assert out.shape == args[0].shape
    assert jnp.allclose(out, ref, atol=1e-5, rtol=1e-5)

    # 2) Fused path with HW = 49 (7x7): lane padding to 128 keeps stores dense.
    args = make_inputs(jax.random.fold_in(key, 1), 2, 8, 7, 7)
    out = jax.block_until_ready(squeeze_excitation(*args))
    ref = squeeze_excitation_ref(*args)
    assert jnp.allclose(out, ref, atol=1e-5, rtol=1e-5)

    # 3) Two-pass fallback (forced here; normally used only when one
    #    (1, C, HW) plane exceeds the per-generation VMEM budget).
    args = make_inputs(jax.random.fold_in(key, 2), 2, 8, 16, 16)
    out = jax.block_until_ready(squeeze_excitation(*args, force_two_pass=True))
    ref = squeeze_excitation_ref(*args)
    assert jnp.allclose(out, ref, atol=1e-5, rtol=1e-5)

    print("KERNEL_OK")
</pallas_src>

<mosaic_0001>
module attributes {stable_mosaic.version = 11 : i64} {
  func.func @_se_fused_kernel(%arg0: i32, %arg1: memref<1x8x256xf32, #tpu.memory_space<vmem>>, %arg2: memref<8x2xf32, #tpu.memory_space<vmem>>, %arg3: memref<1x2xf32, #tpu.memory_space<vmem>>, %arg4: memref<2x8xf32, #tpu.memory_space<vmem>>, %arg5: memref<1x8xf32, #tpu.memory_space<vmem>>, %arg6: memref<1x8x256xf32, #tpu.memory_space<vmem>>) attributes {dimension_semantics = [#tpu.dimension_semantics<parallel>], iteration_bounds = array<i64: 2>, scalar_prefetch = 0 : i64, scratch_operands = 0 : i64, tpu.core_type = #tpu.core_type<tc>, window_params = [{transform_indices = @transform_0, window_bounds = array<i64: 1, 8, 256>}, {pipeline_mode = #tpu.pipeline_mode<synchronous>, transform_indices = @transform_1, window_bounds = array<i64: 8, 2>}, {pipeline_mode = #tpu.pipeline_mode<synchronous>, transform_indices = @transform_2, window_bounds = array<i64: 1, 2>}, {pipeline_mode = #tpu.pipeline_mode<synchronous>, transform_indices = @transform_3, window_bounds = array<i64: 2, 8>}, {pipeline_mode = #tpu.pipeline_mode<synchronous>, transform_indices = @transform_4, window_bounds = array<i64: 1, 8>}, {transform_indices = @transform_5, window_bounds = array<i64: 1, 8, 256>}]} {
    %c0 = arith.constant 0 : index
    %c0_0 = arith.constant 0 : index
    %c0_1 = arith.constant 0 : index
    %0 = vector.load %arg1[%c0, %c0_0, %c0_1] : memref<1x8x256xf32, #tpu.memory_space<vmem>>, vector<1x8x256xf32>
    %cst = arith.constant dense<0.000000e+00> : vector<1x8xf32>
    %1 = vector.multi_reduction <add>, %0, %cst [2] : vector<1x8x256xf32> to vector<1x8xf32>
    %cst_2 = arith.constant 3.906250e-03 : f32
    %2 = vector.broadcast %cst_2 : f32 to vector<1x8xf32>
    %3 = arith.mulf %1, %2 : vector<1x8xf32>
    %c0_3 = arith.constant 0 : index
    %c0_4 = arith.constant 0 : index
    %4 = vector.load %arg2[%c0_3, %c0_4] : memref<8x2xf32, #tpu.memory_space<vmem>>, vector<8x2xf32>
    %cst_5 = arith.constant dense<0.000000e+00> : vector<1x2xf32>
    %5 = tpu.matmul %3, %4, %cst_5 {dimension_numbers = #tpu.dot_dimension_numbers<[1], [0], [0], [1], [0, 0, 1, 1], [], []>} : vector<1x8xf32>, vector<8x2xf32>, vector<1x2xf32> -> vector<1x2xf32>
    %c0_6 = arith.constant 0 : index
    %c0_7 = arith.constant 0 : index
    %6 = vector.load %arg3[%c0_6, %c0_7] : memref<1x2xf32, #tpu.memory_space<vmem>>, vector<1x2xf32>
    %7 = arith.addf %5, %6 : vector<1x2xf32>
    %8 = arith.negf %7 : vector<1x2xf32>
    %9 = math.exp %8 : vector<1x2xf32>
    %cst_8 = arith.constant 1.000000e+00 : f32
    %10 = vector.broadcast %cst_8 : f32 to vector<1x2xf32>
    %11 = arith.addf %10, %9 : vector<1x2xf32>
    %12 = arith.divf %10, %11 : vector<1x2xf32>
    %13 = arith.mulf %7, %12 : vector<1x2xf32>
    %c0_9 = arith.constant 0 : index
    %c0_10 = arith.constant 0 : index
    %14 = vector.load %arg4[%c0_9, %c0_10] : memref<2x8xf32, #tpu.memory_space<vmem>>, vector<2x8xf32>
    %cst_11 = arith.constant dense<0.000000e+00> : vector<1x8xf32>
    %15 = tpu.matmul %13, %14, %cst_11 {dimension_numbers = #tpu.dot_dimension_numbers<[1], [0], [0], [1], [0, 0, 1, 1], [], []>} : vector<1x2xf32>, vector<2x8xf32>, vector<1x8xf32> -> vector<1x8xf32>
    %c0_12 = arith.constant 0 : index
    %c0_13 = arith.constant 0 : index
    %16 = vector.load %arg5[%c0_12, %c0_13] : memref<1x8xf32, #tpu.memory_space<vmem>>, vector<1x8xf32>
    %17 = arith.addf %15, %16 : vector<1x8xf32>
    %18 = arith.negf %17 : vector<1x8xf32>
    %19 = math.exp %18 : vector<1x8xf32>
    %cst_14 = arith.constant 1.000000e+00 : f32
    %20 = vector.broadcast %cst_14 : f32 to vector<1x8xf32>
    %21 = arith.addf %20, %19 : vector<1x8xf32>
    %22 = arith.divf %20, %21 : vector<1x8xf32>
    %c0_15 = arith.constant 0 : index
    %c0_16 = arith.constant 0 : index
    %c0_17 = arith.constant 0 : index
    %23 = vector.load %arg1[%c0_15, %c0_16, %c0_17] : memref<1x8x256xf32, #tpu.memory_space<vmem>>, vector<1x8x256xf32>
    %24 = vector.shape_cast %22 : vector<1x8xf32> to vector<1x8x1xf32>
    %25 = vector.broadcast %24 : vector<1x8x1xf32> to vector<1x8x256xf32>
    %26 = arith.mulf %23, %25 : vector<1x8x256xf32>
    %c0_18 = arith.constant 0 : index
    %c0_19 = arith.constant 0 : index
    %c0_20 = arith.constant 0 : index
    %27 = vector.load %arg6[%c0_18, %c0_19, %c0_20] : memref<1x8x256xf32, #tpu.memory_space<vmem>>, vector<1x8x256xf32>
    tpu.vector_store %arg6[%c0_18, %c0_19, %c0_20], %26 {strides = array<i32>} : memref<1x8x256xf32, #tpu.memory_space<vmem>>, vector<1x8x256xf32>,
    return
  }
  func.func @transform_0(%arg0: i32) -> (i32, i32, i32) {
    %c0_i32 = arith.constant 0 : i32
    %c0_i32_0 = arith.constant 0 : i32
    %c0_i32_1 = arith.constant 0 : i32
    return %arg0, %c0_i32, %c0_i32_0 : i32, i32, i32
  }
  func.func @transform_1(%arg0: i32) -> (i32, i32) {
    %c0_i32 = arith.constant 0 : i32
    %c0_i32_0 = arith.constant 0 : i32
    %c0_i32_1 = arith.constant 0 : i32
    return %c0_i32, %c0_i32_0 : i32, i32
  }
  func.func @transform_2(%arg0: i32) -> (i32, i32) {
    %c0_i32 = arith.constant 0 : i32
    %c0_i32_0 = arith.constant 0 : i32
    %c0_i32_1 = arith.constant 0 : i32
    return %c0_i32, %c0_i32_0 : i32, i32
  }
  func.func @transform_3(%arg0: i32) -> (i32, i32) {
    %c0_i32 = arith.constant 0 : i32
    %c0_i32_0 = arith.constant 0 : i32
    %c0_i32_1 = arith.constant 0 : i32
    return %c0_i32, %c0_i32_0 : i32, i32
  }
  func.func @transform_4(%arg0: i32) -> (i32, i32) {
    %c0_i32 = arith.constant 0 : i32
    %c0_i32_0 = arith.constant 0 : i32
    %c0_i32_1 = arith.constant 0 : i32
    return %c0_i32, %c0_i32_0 : i32, i32
  }
  func.func @transform_5(%arg0: i32) -> (i32, i32, i32) {
    %c0_i32 = arith.constant 0 : i32
    %c0_i32_0 = arith.constant 0 : i32
    %c0_i32_1 = arith.constant 0 : i32
    return %arg0, %c0_i32, %c0_i32_0 : i32, i32, i32
  }
}

</mosaic_0001>

<bundles_post_ra>
// kernel: squeeze_excitation.1
= control target key start
LH: loop header
LB: loop body
LE: loop exit
PB: predicated region body
PF: predicated region fallthrough
CT: control target
= control target key end

     0   :  { %s562_s18 = smov 0   ;;  %s598_s0 = inlined_call_operand.vmem [shape: f32[2,8,256], index: 0, kind: input, shape index: {}]   ;;  %s599_s1 = inlined_call_operand.vmem [shape: f32[8,2], index: 1, kind: input, shape index: {}]   ;;  %s600_s2 = inlined_call_operand.vmem [shape: f32[1,2], index: 2, kind: input, shape index: {}]   ;;  %s601_s3 = inlined_call_operand.vmem [shape: f32[2,8], index: 3, kind: input, shape index: {}]   ;;  %s602_s4 = inlined_call_operand.vmem [shape: f32[1,8], index: 4, kind: input, shape index: {}]   ;;  %s603_s5 = inlined_call_operand.vmem [shape: f32[2,8,256], index: 5, kind: output, shape index: {}]  }
   0x1 LB: > { %s472_s19 = sadd.s32 4294967295, %s528_s18   ;;  %p476_p0 = scmp.ge.s32.totalorder %s528_s18, 1  ;;  %s528_s18 = sphi %s562_s18, %s15_s18  }
   0x2   : > { %p187_p1 = scmp.lt.s32.totalorder %s528_s18, 3 }
   0x4   : > { %p188_p2 = pnand %p476_p0, %p187_p1 }
   0x5   : > { %p215_p3 = scmp.lt.s32.totalorder (!%p188_p2), %s472_s19, 1  ;;  %v530_v3 = vmov (!%p188_p2), 0.0   ;;  %v231_v4 = vld [vmem:[%s599_s1] sm:$0xff] (!%p188_p2)  ;;  %vm531_vm0 = vmmov (!%p188_p2), 0   ;;  %v234_v5 = vlaneseq (!%p188_p2)  ;;  %vm240_vm1 = vcmask (!%p188_p2), 64512  }
   0x6   : > { %191 = sbr.rel (%p188_p2) target bundleno = 767 (0x2ff), region = 40  ;;  %494 = vmatprep.subr.mxu0 (!%p188_p2), %v530_v3  ;;  %499 = vmatprep.subr.mxu1 (!%p188_p2), %v530_v3  ;;  %v320_v12 = vld [vmem:[%s601_s3] sm:$0x3] (!%p188_p2)  ;;  %vm326_vm2 = vcmask (!%p188_p2), 1041408   ;;  %vm322_vm3 = vcmask (!%p188_p2), 15360  }
   0x7   : > { %495 = vmatpush3.msra.mxu0 (!%p188_p2), %v231_v4  ;;  %496 = vmatprep.mubr.msk.f32.mxu0 (!%p188_p2), %vm531_vm0, %v530_v3  ;;  %v235_v6 = vand.u32 (!%p188_p2), 127, %v234_v5  ;;  %v237_v7 = vshrl.u32 (!%p188_p2), %v234_v5, 7  ;;  %v232_v13 = vld [vmem:[%s600_s2] sm:$0x1] (!%p188_p2) }
   0x8   : > { %501 = vmatprep.mubr.msk.f32.mxu1 (!%p188_p2), %vm531_vm0, %v530_v3  ;;  %500 = vmatpush3.msk.msra.mxu1 (!%p188_p2), %vm326_vm2, %v320_v12  ;;  %v321_v22 = vld [vmem:[%s602_s4] sm:$0x1] (!%p188_p2) }
   0x9   : > { %v238_v8 = vsub.s32 (!%p188_p2), %v235_v6, %v237_v7  ;;  %v408_v29 = vsub.s32 (!%p188_p2), 0, %v237_v7 }
   0xd   : > { %s605_s19 = smov (!%p215_p3, %s472_s19), 1 }
   0xe   : > { %s488_s20 = sshll.u32 %s605_s19, 4 }
   0xf   : > { %s219_s23 = scalar_lea.vmem %s598_s0, %s488_s20  ;;  %s224_s9 = scalar_lea.vmem %s603_s5, %s488_s20 }
  0x10   : > { %v225_v0 = vld [vmem:[%s219_s23] sm:$0xff]  ;;  %v226_v1 = vld [vmem:[%s219_s23 + $0x8] sm:$0xff] }
  0x11   : > { %v227_v2 = vadd.f32 %v226_v1, %v225_v0 }
  0x13   : > { %228 = vadd.xlane.f32.xlu0 %v227_v2 }
  0xa0   : > { %v229_v9 = vpop.xlane.xlu0 %228 }
  0xa1   : > { %v230_v10 = vmul.f32 0.00390625, %v229_v9 }
  0xa3   : > { %v239_v11 = vrot.slane %v230_v10, %v238_v8 }
  0xa5   : > { %497 = vmatmul.mubr.msk.f32.vlgmr.msra.gmra.mrb[0].mxu0 %vm240_vm1, %v239_v11 }
 0x178   : > { %v309_v14 = vpop.f32.mrb[0].mxu0 }
 0x179   : > { %v310_v15 = vadd.f32 %v309_v14, %v232_v13  ;;  %v498_v16 = vpop.f32.mrb[1].mxu0 }
 0x17b   : > { %v482_v17 = vmul.f32 -1.442695, %v310_v15 }
 0x17d   : > { %514 = vpow2.f32 %v482_v17 }
 0x187   : > { %v515_v18 = vpop.eup %514 }
 0x188   : > { %v316_v19 = vadd.f32 1.0, %v515_v18 }
 0x18a   : > { %516 = vrcp.f32 %v316_v19 }
 0x194   : > { %v517_v20 = vpop.eup %516 }
 0x195   : > { %v319_v21 = vmul.f32 %v517_v20, %v310_v15 }
 0x197   : > { %502 = vmatmul.mubr.msk.f32.vlgmr.msra.gmra.mrb[0].mxu1 %vm322_vm3, %v319_v21 }
 0x26a   : > { %v396_v23 = vpop.f32.mrb[0].mxu1 }
 0x26b   : > { %v397_v24 = vadd.f32 %v396_v23, %v321_v22  ;;  %v503_v25 = vpop.f32.mrb[1].mxu1 }
 0x26d   : > { %v485_v26 = vmul.f32 -1.442695, %v397_v24 }
 0x26f   : > { %518 = vpow2.f32 %v485_v26 }
 0x279   : > { %v519_v27 = vpop.eup %518 }
 0x27a   : > { %v403_v28 = vadd.f32 1.0, %v519_v27 }
 0x27c   : > { %520 = vrcp.f32 %v403_v28 }
 0x286   : > { %v521_v30 = vpop.eup %520 }
 0x287   : > { %v409_v31 = vrot.slane %v521_v30, %v408_v29 }
 0x289   : > { %411 = vbcast.lane.b32.xlu0 %v409_v31, 256 }
 0x2fb   : > { %v412_v32 = vpop.permute.xlu0 %411 }
 0x2fc   : > { %v413_v33 = vmul.f32 %v412_v32, %v225_v0  ;;  %v414_v34 = vmul.f32 %v412_v32, %v226_v1 }
 0x2fe   : > { %415 = vst [vmem:[%s224_s9] sm:$0xff] %v413_v33  ;;  %416 = vst [vmem:[%s224_s9 + $0x8] sm:$0xff] %v414_v34 }
 0x2ff PF: > { %s15_s18 = sadd.s32 1, %s528_s18  }
 0x300   : > { %p12_p4 = scmp.ge.s32.totalorder %s15_s18, 4  }
 0x302   :  { %14 = sbr.rel (!%p12_p4) target bundleno = 1 (0x1), region = 70 }

</bundles_post_ra>
